<compile_context>
chip_gen: v6e
topology: v6e:2x2x1
jax: 0.10.0
libtpu: 0.0.40
codegen_flags: <defaults>
</compile_context>

<pallas_src>
import math

import jax
import jax.numpy as jnp
from jax.experimental import pallas as pl
from jax.experimental.pallas import tpu as pltpu

_LANE = 128


def _make_kernel(n):
    def kernel(p_ref, x_ref, o_ref):
        # p_ref: (n,) softmax weights in SMEM (scalar reads -> vector splats)
        # x_ref: (n, tm, 128) stacked input row-tile in VMEM
        # o_ref: (tm, 128) output row-tile
        acc = p_ref[0] * x_ref[0].astype(jnp.float32)
        for k in range(1, n):  # n is a small static Python int -> unrolled FMAs
            acc = acc + p_ref[k] * x_ref[k].astype(jnp.float32)
        o_ref[...] = acc.astype(o_ref.dtype)

    return kernel


def _round_up(x, m):
    return -(-x // m) * m


def _choose_tm(n, m_rows, dtype):
    """Largest row tile such that double-buffered (n inputs + 1 output) tiles fit
    comfortably in the smallest default scoped-VMEM budget (v5e: 16 MiB)."""
    itemsize = jnp.dtype(dtype).itemsize
    budget = 12 * 1024 * 1024                      # conservative across v5e/v6e/v7x
    sublane = 8 if itemsize >= 4 else (16 if itemsize == 2 else 32)
    tm_cap = budget // (2 * (n + 1) * _LANE * itemsize)
    tm = max(sublane, min(2048, (tm_cap // sublane) * sublane))
    tm = min(tm, _round_up(m_rows, sublane))       # don't exceed (padded) row count
    return tm


def weight_average_norate(W, inputs):
    """softmax(W)-weighted sum of `inputs` (list of n same-shaped arrays)."""
    n = len(inputs)
    assert W.shape == (n,)
    shape = inputs[0].shape
    dtype = inputs[0].dtype
    total = math.prod(shape)

    # One-time softmax of the (n,) parameter, outside the per-tile path.
    p = jax.nn.softmax(W.astype(jnp.float32), axis=0)

    # Flatten to lane-dense (M, 128) slabs; pad the tail with zeros so any shape
    # works with large tiles (padded rows contribute zeros and are sliced off).
    total_pad = _round_up(total, _LANE)
    m_rows = total_pad // _LANE
    tm = _choose_tm(n, m_rows, dtype)
    m_pad = _round_up(m_rows, tm)

    def to_slab(x):
        flat = x.reshape(-1)
        flat = jnp.pad(flat, (0, m_pad * _LANE - total))
        return flat.reshape(m_pad, _LANE)

    stacked = jnp.stack([to_slab(x) for x in inputs], axis=0)  # (n, m_pad, 128)

    out2d = pl.pallas_call(
        _make_kernel(n),
        out_shape=jax.ShapeDtypeStruct((m_pad, _LANE), dtype),
        grid=(m_pad // tm,),
        in_specs=[
            # Tiny weight vector lives in SMEM: no per-step VMEM staging of a
            # padded (8,128) vreg, no lane-slice extraction.
            pl.BlockSpec(memory_space=pltpu.MemorySpace.SMEM),
            # All n inputs for one large row tile.
            pl.BlockSpec((n, tm, _LANE), lambda i: (0, i, 0)),
        ],
        out_specs=pl.BlockSpec((tm, _LANE), lambda i: (i, 0)),
        compiler_params=pltpu.CompilerParams(
            dimension_semantics=("parallel",)),
    )(p, stacked)

    return out2d.reshape(-1)[:total].reshape(shape)


if __name__ == "__main__":
    # Module config: n inputs; `fixed` only affects grads, not the forward pass.
    n = 4
    B, C, H, Wd = 2, 4, 16, 16

    key = jax.random.PRNGKey(0)
    keys = jax.random.split(key, n)
    inputs = [jax.random.normal(k, (B, C, H, Wd), dtype=jnp.float32) for k in keys]

    # Parameter init exactly as in the module's __init__: zeros(n).
    W = jnp.zeros((n,), dtype=jnp.float32)

    out = weight_average_norate(W, inputs)
    jax.block_until_ready(out)

    # Pure-JAX reference check of the forward semantics.
    p = jax.nn.softmax(W, axis=0)
    ref = sum(p[k] * inputs[k] for k in range(n))
    assert out.shape == ref.shape
    assert jnp.allclose(out, ref, atol=1e-5, rtol=1e-5)

    print("KERNEL_OK")
</pallas_src>

<mosaic_0001>
module attributes {stable_mosaic.version = 11 : i64} {
  func.func @kernel(%arg0: i32, %arg1: memref<4xf32, #tpu.memory_space<smem>>, %arg2: memref<4x16x128xf32, #tpu.memory_space<vmem>>, %arg3: memref<16x128xf32, #tpu.memory_space<vmem>>) attributes {dimension_semantics = [#tpu.dimension_semantics<parallel>], iteration_bounds = array<i64: 1>, scalar_prefetch = 0 : i64, scratch_operands = 0 : i64, tpu.core_type = #tpu.core_type<tc>, window_params = [{transform_indices = @transform_0, window_bounds = array<i64: 4>}, {transform_indices = @transform_1, window_bounds = array<i64: 4, 16, 128>}, {transform_indices = @transform_2, window_bounds = array<i64: 16, 128>}]} {
    %c0 = arith.constant 0 : index
    %0 = memref.load %arg1[%c0] : memref<4xf32, #tpu.memory_space<smem>>
    %c0_0 = arith.constant 0 : index
    %c0_1 = arith.constant 0 : index
    %c0_2 = arith.constant 0 : index
    %1 = vector.load %arg2[%c0_0, %c0_1, %c0_2] : memref<4x16x128xf32, #tpu.memory_space<vmem>>, vector<1x16x128xf32>
    %2 = vector.shape_cast %1 : vector<1x16x128xf32> to vector<16x128xf32>
    %3 = vector.broadcast %0 : f32 to vector<16x128xf32>
    %4 = arith.mulf %3, %2 : vector<16x128xf32>
    %c1 = arith.constant 1 : index
    %5 = memref.load %arg1[%c1] : memref<4xf32, #tpu.memory_space<smem>>
    %c1_3 = arith.constant 1 : index
    %c0_4 = arith.constant 0 : index
    %c0_5 = arith.constant 0 : index
    %6 = vector.load %arg2[%c1_3, %c0_4, %c0_5] : memref<4x16x128xf32, #tpu.memory_space<vmem>>, vector<1x16x128xf32>
    %7 = vector.shape_cast %6 : vector<1x16x128xf32> to vector<16x128xf32>
    %8 = vector.broadcast %5 : f32 to vector<16x128xf32>
    %9 = arith.mulf %8, %7 : vector<16x128xf32>
    %10 = arith.addf %4, %9 : vector<16x128xf32>
    %c2 = arith.constant 2 : index
    %11 = memref.load %arg1[%c2] : memref<4xf32, #tpu.memory_space<smem>>
    %c2_6 = arith.constant 2 : index
    %c0_7 = arith.constant 0 : index
    %c0_8 = arith.constant 0 : index
    %12 = vector.load %arg2[%c2_6, %c0_7, %c0_8] : memref<4x16x128xf32, #tpu.memory_space<vmem>>, vector<1x16x128xf32>
    %13 = vector.shape_cast %12 : vector<1x16x128xf32> to vector<16x128xf32>
    %14 = vector.broadcast %11 : f32 to vector<16x128xf32>
    %15 = arith.mulf %14, %13 : vector<16x128xf32>
    %16 = arith.addf %10, %15 : vector<16x128xf32>
    %c3 = arith.constant 3 : index
    %17 = memref.load %arg1[%c3] : memref<4xf32, #tpu.memory_space<smem>>
    %c3_9 = arith.constant 3 : index
    %c0_10 = arith.constant 0 : index
    %c0_11 = arith.constant 0 : index
    %18 = vector.load %arg2[%c3_9, %c0_10, %c0_11] : memref<4x16x128xf32, #tpu.memory_space<vmem>>, vector<1x16x128xf32>
    %19 = vector.shape_cast %18 : vector<1x16x128xf32> to vector<16x128xf32>
    %20 = vector.broadcast %17 : f32 to vector<16x128xf32>
    %21 = arith.mulf %20, %19 : vector<16x128xf32>
    %22 = arith.addf %16, %21 : vector<16x128xf32>
    %c0_12 = arith.constant 0 : index
    %c0_13 = arith.constant 0 : index
    %23 = vector.load %arg3[%c0_12, %c0_13] : memref<16x128xf32, #tpu.memory_space<vmem>>, vector<16x128xf32>
    tpu.vector_store %arg3[%c0_12, %c0_13], %22 {strides = array<i32>} : memref<16x128xf32, #tpu.memory_space<vmem>>, vector<16x128xf32>,
    return
  }
  func.func @transform_0(%arg0: i32) -> i32 {
    %c0_i32 = arith.constant 0 : i32
    %c0_i32_0 = arith.constant 0 : i32
    return %c0_i32 : i32
  }
  func.func @transform_1(%arg0: i32) -> (i32, i32, i32) {
    %c0_i32 = arith.constant 0 : i32
    %c0_i32_0 = arith.constant 0 : i32
    %c0_i32_1 = arith.constant 0 : i32
    return %c0_i32, %arg0, %c0_i32_0 : i32, i32, i32
  }
  func.func @transform_2(%arg0: i32) -> (i32, i32) {
    %c0_i32 = arith.constant 0 : i32
    %c0_i32_0 = arith.constant 0 : i32
    return %arg0, %c0_i32 : i32, i32
  }
}

</mosaic_0001>

<bundles_post_ra>
// kernel: tpu_custom_call.1
= control target key start
LH: loop header
LB: loop body
LE: loop exit
PB: predicated region body
PF: predicated region fallthrough
CT: control target
= control target key end

     0   :  { %7 = vsyncpa [#allocation5], 0  ;;  %s187_s0 = inlined_call_operand.hbm [shape: f32[4], index: 0, kind: input, shape index: {}]   ;;  %s188_s1 = inlined_call_operand.hbm [shape: f32[4,16,128], index: 1, kind: input, shape index: {}]   ;;  %s189_s2 = inlined_call_operand.hbm [shape: f32[16,128], index: 2, kind: output, shape index: {}]  }
   0x1   :  { %8 = vsyncpa [#allocation3], 0 }
   0x2   :  { %9 = vsyncpa [#allocation4], 0  ;;  %s152_s9 = smov [#allocation2]   ;;  %s153_s12 = smov [#allocation6]  }
   0x3   :  { %17 = dma.hbm_to_smem %s187_s0, 16, %s152_s9, [#allocation5]  }
   0x4   :  { %s23_s13 = sshll.u32 %s153_s12, 4  ;;  %s24_s13 = int_to_ptr.vmem [resolvable:$true] %s23_s13 }
   0x5   :  { %s114_s14 = scalar_lea.vmem %s24_s13, 1024  ;;  %p119_p1 = scmp.lt.s32.totalorder %s24_s13, %s24_s13 }
   0x6   :  { %p115_p0 = scmp.ne.s32.totalorder %s24_s13, %s114_s14  ;;  %p120_p2 = scmp.lt.s32.totalorder %s114_s14, %s114_s14 }
   0x8   :  { %p121_p3 = por %p120_p2, %p119_p1 }
   0xa   :  { %p122_p4 = pnand %p121_p3, %p115_p0 }
   0xc   :  { %125 = shalt.err (!%p122_p4)
}
   0xd   :  { %s154_s15 = smov 128   ;;  %s155_s16 = smov 8  }
   0xe   :  { %29 = dma.hbm_to_vmem [thread:$0]  %s188_s1, 1024, %s24_s13, [#allocation3], %s154_s15, %s154_s15, %s155_s16  }
   0xf   :  { %146 = dma.done.wait [#allocation5], 16  }
  0x10   :  { %147 = vsyncadd [#allocation5], 4294967280 }
  0x11   :  { %148 = dma.done.wait [#allocation3], 1024  }
  0x12   :  { %149 = vsyncadd [#allocation3], 4294966272 }
  0x13   :  { %36 = sfence }
  0x14   :  { %s37_s0 = sld [smem:[#allocation2]]  ;;  %v38_v0 = vld [vmem:[#allocation6] sm:$0xff]  ;;  %v39_v1 = vld [vmem:[#allocation6 + $0x8] sm:$0xff]  ;;  %v45_v2 = vld [vmem:[#allocation6 + $0x10] sm:$0xff]  ;;  %s156_s1 = smov [#allocation7]  }
  0x15   :  { %s90_s19 = sld [smem:[#allocation2 + $0x1]]  ;;  %v46_v3 = vld [vmem:[#allocation6 + $0x18] sm:$0xff]  ;;  %v54_v5 = vld [vmem:[#allocation6 + $0x20] sm:$0xff]  ;;  %v55_v6 = vld [vmem:[#allocation6 + $0x28] sm:$0xff]  ;;  %s77_s22 = sshll.u32 %s156_s1, 4  ;;  %s78_s22 = int_to_ptr.vmem [resolvable:$true] %s77_s22 }
  0x16   :  { %s91_s20 = sld [smem:[#allocation2 + $0x2]]  ;;  %v63_v9 = vld [vmem:[#allocation6 + $0x30] sm:$0xff]  ;;  %v64_v11 = vld [vmem:[#allocation6 + $0x38] sm:$0xff]  ;;  %s126_s23 = scalar_lea.vmem %s78_s22, 256 }
  0x17   :  { %s92_s21 = sld [smem:[#allocation2 + $0x3]]  ;;  %p127_p5 = scmp.ne.s32.totalorder %s78_s22, %s126_s23 }
  0x18   :  { %p131_p6 = scmp.lt.s32.totalorder %s78_s22, %s78_s22  ;;  %p132_p7 = scmp.lt.s32.totalorder %s126_s23, %s126_s23 }
  0x1a   :  { %v40_v4 = vstv %s37_s0  ;;  %p133_p8 = por %p132_p7, %p131_p6 }
  0x1b   :  { %v41_v7 = vmul.f32 %v40_v4, %v38_v0  ;;  %v47_v8 = vstv %s90_s19  ;;  %v42_v10 = vmul.f32 %v40_v4, %v39_v1 }
  0x1c   :  { %v48_v12 = vmul.f32 %v47_v8, %v45_v2  ;;  %v56_v13 = vstv %s91_s20  ;;  %v49_v14 = vmul.f32 %v47_v8, %v46_v3  ;;  %p134_p9 = pnand %p133_p8, %p127_p5 }
  0x1d   :  { %v57_v15 = vmul.f32 %v56_v13, %v54_v5  ;;  %v65_v16 = vstv %s92_s21  ;;  %v58_v17 = vmul.f32 %v56_v13, %v55_v6 }
  0x1e   :  { %v50_v18 = vadd.f32 %v48_v12, %v41_v7  ;;  %v66_v19 = vmul.f32 %v65_v16, %v63_v9  ;;  %v51_v20 = vadd.f32 %v49_v14, %v42_v10  ;;  %v67_v21 = vmul.f32 %v65_v16, %v64_v11 }
  0x20   :  { %v59_v22 = vadd.f32 %v57_v15, %v50_v18  ;;  %v60_v23 = vadd.f32 %v58_v17, %v51_v20 }
  0x22   :  { %v68_v24 = vadd.f32 %v66_v19, %v59_v22  ;;  %v69_v25 = vadd.f32 %v67_v21, %v60_v23 }
  0x24   :  { %70 = vst [vmem:[#allocation7] sm:$0xff] %v68_v24  ;;  %71 = vst [vmem:[#allocation7 + $0x8] sm:$0xff] %v69_v25 }
  0x25   :  { %137 = shalt.err (!%p134_p9)
}
  0x26   :  { %83 = dma.vmem_to_hbm [thread:$0]  %s78_s22, 256, %s189_s2, [#allocation4], %s154_s15, %s154_s15, %s155_s16  }
  0x27   :  { %150 = dma.done.wait [#allocation4], 256  }
  0x28   :  { %151 = vsyncadd [#allocation4], 4294967040 }
  0x29   :  { %87 = vsyncpa [#allocation3], 1 }
  0x2a   :  { %88 = vsyncpa [#allocation4], 1 }
  0x2b   :  { %89 = vsyncpa [#allocation5], 1 }

</bundles_post_ra>
